<compile_context>
chip_gen: v5e
topology: v5e:2x2
jax: 0.10.0
libtpu: 0.0.40
codegen_flags: <defaults>
</compile_context>

<pallas_src>
import jax
import jax.numpy as jnp
from jax import lax
from jax.experimental import pallas as pl
from jax.experimental.pallas import tpu as pltpu


_LANE = 128      # TPU lane width
_CHUNK = 512     # in-kernel sub-tile of the lane axis (bounds vreg pressure)
_MAX_TS = 8192   # spatial-tile cap; beyond this per-step overhead is already ~free


def _round_down(v, m):
    return max(m, (v // m) * m)


def _vmem_capacity_bytes():
    """Per-core VMEM capacity; conservative fallback if the query is unavailable."""
    try:
        return int(pltpu.get_tpu_info().vmem_capacity_bytes)
    except Exception:
        return 64 << 20  # v7x per-TensorCore VMEM (smallest of the three generations)


def _choose_tiles(B, C, S, ncls, in_bytes, out_bytes, vmem_budget):
    """Pick (batch_tile, spatial_tile) for the (batch, spatial) grid.

    Goals: big lane-dense spatial tiles to amortize the ~0.35us/step pipeline
    cost, fold batch into the block where the grid has spare steps, keep >= 2
    steps on a "parallel" axis so both v7x TensorCores get work, and size
    everything against the (double-buffered) VMEM budget.

    Invariant: the returned ts is either <= _CHUNK, or a multiple of _CHUNK,
    so the in-kernel chunk loop always covers the whole tile.
    """
    # Double-buffered x + out bytes per lane per batch element.
    per_lane = 2 * (C * in_bytes + ncls * out_bytes)
    max_lanes = max(_LANE, vmem_budget // per_lane)

    # --- spatial (lane-axis) tile ---
    if S <= _CHUNK and S <= max_lanes:
        ts = S                                   # whole spatial extent in one block
    else:
        ts = min(S, max_lanes, _MAX_TS)
        ts = _round_down(ts, _CHUNK) if ts >= _CHUNK else _round_down(ts, _LANE)
    num_s = pl.cdiv(S, ts)

    # --- batch tile ---
    if B == 1:
        tb = 1
        if num_s == 1 and S >= 2 * _LANE:
            # Force >= 2 spatial steps so the v7x megacore is not left idle.
            half = pl.cdiv(S, 2)
            ts = _round_down(half, _CHUNK) if half >= _CHUNK else _round_down(half, _LANE)
    elif num_s >= 2:
        # Spatial axis already provides parallel steps: fold as much batch as fits.
        tb = min(B, max(1, vmem_budget // (per_lane * ts)))
    else:
        # Single spatial block: split the batch over >= 2 steps, fold the rest.
        tb = max(1, B // 2)
        tb = min(tb, max(1, vmem_budget // (per_lane * ts)))
    return tb, ts


def _seg_head_kernel(x_ref, w1t_ref, b1_ref, w2t_ref, b2_ref, o_ref):
    # x_ref : (TB, C, TS)    NCHW block, spatial flattened on the lane axis
    # w1t   : (HID, C)       first 1x1 conv, pre-transposed (full array)
    # b1    : (HID, 1)
    # w2t   : (NCLS, HID)    second 1x1 conv, pre-transposed (full array)
    # b2    : (NCLS, 1)
    # o_ref : (TB, NCLS, TS) logits block (lane-dense spatial axis)
    tb = x_ref.shape[0]
    ts = x_ref.shape[-1]
    w1t = w1t_ref[...]
    b1 = b1_ref[...]
    w2t = w2t_ref[...]
    b2 = b2_ref[...]

    # Sub-tile the lane axis: the DMA tile stays large (amortizes per-step
    # cost) while the f32 (HID, chunk) intermediate stays small in vregs.
    # Tile selection guarantees chunk divides ts.
    chunk = ts if ts <= _CHUNK else _CHUNK

    def do_chunk(ci, carry):
        s0 = pl.multiple_of(ci * chunk, chunk)
        for b in range(tb):  # static unroll; each iteration is a pair of 2-D MXU matmuls
            x = x_ref[b, :, pl.ds(s0, chunk)]                            # (C, chunk)
            h = jnp.dot(w1t, x, preferred_element_type=jnp.float32)      # (HID, chunk)
            h = jnp.maximum(h + b1, 0.0)                                 # bias + ReLU in f32
            y = jnp.dot(w2t, h, preferred_element_type=jnp.float32)      # (NCLS, chunk)
            o_ref[b, :, pl.ds(s0, chunk)] = (y + b2).astype(o_ref.dtype)
        return carry

    lax.fori_loop(0, ts // chunk, do_chunk, 0, unroll=True)


def seg_model_out(x_nchw, w1, b1, w2, b2, *, out_dtype=None):
    """Synthetic model(x)['out']: NCHW in -> NCHW logits out (no transposes)."""
    B, C, H, W = x_nchw.shape
    hid = w1.shape[1]
    ncls = w2.shape[1]
    S = H * W
    out_dtype = x_nchw.dtype if out_dtype is None else jnp.dtype(out_dtype)
    in_bytes = jnp.dtype(x_nchw.dtype).itemsize
    out_bytes = jnp.dtype(out_dtype).itemsize

    # Free reshape: merge contiguous minor dims (no data movement).
    x_flat = x_nchw.reshape(B, C, S)

    vmem_cap = _vmem_capacity_bytes()
    vmem_budget = int(vmem_cap * 0.4)  # headroom for weights / compiler scratch
    tb, ts = _choose_tiles(B, C, S, ncls, in_bytes, out_bytes, vmem_budget)
    grid = (pl.cdiv(B, tb), pl.cdiv(S, ts))

    # One-time tiny weight prep (glue, outside the kernel).
    w1t = jnp.transpose(w1)            # (hid, C)
    w2t = jnp.transpose(w2)            # (ncls, hid)
    b1c = b1.reshape(hid, 1)
    b2c = b2.reshape(ncls, 1)

    weight_bytes = 4 * (hid * C + hid + ncls * hid + ncls)
    blocks_bytes = 2 * tb * ts * (C * in_bytes + ncls * out_bytes)
    vmem_limit = int(min(vmem_cap,
                         max(blocks_bytes + 2 * weight_bytes + (8 << 20), 32 << 20)))

    cost = pl.CostEstimate(
        flops=2 * B * S * (C * hid + hid * ncls),
        bytes_accessed=B * S * (C * in_bytes + ncls * out_bytes) + weight_bytes,
        transcendentals=0,
    )

    def build(single_buffer_weights):
        # Constant index_map => weights are fetched once; single-buffering them
        # only matters when they are big (frees VMEM for larger spatial tiles,
        # most valuable on v7x's 64 MiB).
        w_mode = ({"pipeline_mode": pl.Buffered(buffer_count=1)}
                  if single_buffer_weights else {})
        return pl.pallas_call(
            _seg_head_kernel,
            out_shape=jax.ShapeDtypeStruct((B, ncls, S), out_dtype),
            grid_spec=pl.GridSpec(
                grid=grid,
                in_specs=[
                    pl.BlockSpec((tb, C, ts), lambda b, s: (b, 0, s)),        # x block
                    pl.BlockSpec((hid, C), lambda b, s: (0, 0), **w_mode),    # w1^T
                    pl.BlockSpec((hid, 1), lambda b, s: (0, 0), **w_mode),    # b1
                    pl.BlockSpec((ncls, hid), lambda b, s: (0, 0), **w_mode), # w2^T
                    pl.BlockSpec((ncls, 1), lambda b, s: (0, 0), **w_mode),   # b2
                ],
                out_specs=pl.BlockSpec((tb, ncls, ts), lambda b, s: (b, 0, s)),
            ),
            compiler_params=pltpu.CompilerParams(
                dimension_semantics=("parallel", "parallel"),
                vmem_limit_bytes=vmem_limit,
            ),
            cost_estimate=cost,
        )

    want_single_buf = weight_bytes >= (1 << 20)
    if want_single_buf:
        try:
            out_flat = build(True)(x_flat, w1t, b1c, w2t, b2c)
        except Exception:
            # pipeline_mode support varies across jax versions; fall back to the
            # default double-buffered weights rather than failing.
            out_flat = build(False)(x_flat, w1t, b1c, w2t, b2c)
    else:
        out_flat = build(False)(x_flat, w1t, b1c, w2t, b2c)

    # Free reshape back: [B, ncls, H*W] -> [B, ncls, H, W] (NCHW).
    return out_flat.reshape(B, ncls, H, W)


class SegmentationModelOutputWrapperPallas:
    """Mirror of the PyTorch wrapper: forward(x) = model(x)['out']."""

    def __init__(self, model_fn):
        self.model_fn = model_fn  # returns a dict with key 'out'

    def __call__(self, x):
        return self.model_fn(x)["out"]


def _ref_forward(x_nchw, w1, b1, w2, b2):
    # Pure-JAX reference for the synthetic head (1x1 convs as matmuls).
    x = jnp.transpose(x_nchw, (0, 2, 3, 1)).astype(jnp.float32)
    h = jnp.maximum(x @ w1 + b1, 0.0)
    o = h @ w2 + b2
    return jnp.transpose(o, (0, 3, 1, 2))


if __name__ == "__main__":
    key = jax.random.PRNGKey(0)
    k_x, k_w1, k_b1, k_w2, k_b2 = jax.random.split(key, 5)

    B, C, H, W = 2, 4, 16, 16     # input NCHW
    HID, NCLS = 32, 8             # synthetic segmentation head sizes

    x = jax.random.normal(k_x, (B, C, H, W), dtype=jnp.float32)
    w1 = jax.random.normal(k_w1, (C, HID), dtype=jnp.float32) * 0.1
    b1 = jax.random.normal(k_b1, (HID,), dtype=jnp.float32) * 0.1
    w2 = jax.random.normal(k_w2, (HID, NCLS), dtype=jnp.float32) * 0.1
    b2 = jax.random.normal(k_b2, (NCLS,), dtype=jnp.float32) * 0.1

    # The synthetic "model" returns a dict with 'out', exactly like torchvision
    # segmentation models; the wrapper extracts 'out'.
    def synthetic_model(inp):
        return {"out": seg_model_out(inp, w1, b1, w2, b2)}

    wrapper = SegmentationModelOutputWrapperPallas(synthetic_model)

    out = jax.block_until_ready(wrapper(x))
    assert out.shape == (B, NCLS, H, W), out.shape

    ref = _ref_forward(x, w1, b1, w2, b2)
    assert jnp.allclose(out, ref, atol=1e-5, rtol=1e-5), "mismatch vs reference"

    print("KERNEL_OK")
</pallas_src>

<mosaic_0001>
module attributes {stable_mosaic.version = 11 : i64} {
  func.func @_seg_head_kernel(%arg0: i32, %arg1: i32, %arg2: memref<1x4x256xf32, #tpu.memory_space<vmem>>, %arg3: memref<32x4xf32, #tpu.memory_space<vmem>>, %arg4: memref<32x1xf32, #tpu.memory_space<vmem>>, %arg5: memref<8x32xf32, #tpu.memory_space<vmem>>, %arg6: memref<8x1xf32, #tpu.memory_space<vmem>>, %arg7: memref<1x8x256xf32, #tpu.memory_space<vmem>>) attributes {dimension_semantics = [#tpu.dimension_semantics<parallel>, #tpu.dimension_semantics<parallel>], iteration_bounds = array<i64: 2, 1>, scalar_prefetch = 0 : i64, scratch_operands = 0 : i64, tpu.core_type = #tpu.core_type<tc>, window_params = [{transform_indices = @transform_0, window_bounds = array<i64: 1, 4, 256>}, {pipeline_mode = #tpu.pipeline_mode<synchronous>, transform_indices = @transform_1, window_bounds = array<i64: 32, 4>}, {pipeline_mode = #tpu.pipeline_mode<synchronous>, transform_indices = @transform_2, window_bounds = array<i64: 32, 1>}, {pipeline_mode = #tpu.pipeline_mode<synchronous>, transform_indices = @transform_3, window_bounds = array<i64: 8, 32>}, {pipeline_mode = #tpu.pipeline_mode<synchronous>, transform_indices = @transform_4, window_bounds = array<i64: 8, 1>}, {transform_indices = @transform_5, window_bounds = array<i64: 1, 8, 256>}]} {
    %c0 = arith.constant 0 : index
    %c0_0 = arith.constant 0 : index
    %0 = vector.load %arg3[%c0, %c0_0] : memref<32x4xf32, #tpu.memory_space<vmem>>, vector<32x4xf32>
    %c0_1 = arith.constant 0 : index
    %c0_2 = arith.constant 0 : index
    %1 = vector.load %arg4[%c0_1, %c0_2] : memref<32x1xf32, #tpu.memory_space<vmem>>, vector<32x1xf32>
    %c0_3 = arith.constant 0 : index
    %c0_4 = arith.constant 0 : index
    %2 = vector.load %arg5[%c0_3, %c0_4] : memref<8x32xf32, #tpu.memory_space<vmem>>, vector<8x32xf32>
    %c0_5 = arith.constant 0 : index
    %c0_6 = arith.constant 0 : index
    %3 = vector.load %arg6[%c0_5, %c0_6] : memref<8x1xf32, #tpu.memory_space<vmem>>, vector<8x1xf32>
    %c0_i32 = arith.constant 0 : i32
    %c256_i32 = arith.constant 256 : i32
    %4 = arith.muli %c0_i32, %c256_i32 : i32
    %5 = tpu.assume_multiple %4, 256 : i32
    %c0_7 = arith.constant 0 : index
    %c0_8 = arith.constant 0 : index
    %6 = arith.index_cast %5 : i32 to index
    %7 = vector.load %arg2[%c0_7, %c0_8, %6] : memref<1x4x256xf32, #tpu.memory_space<vmem>>, vector<1x4x256xf32>
    %8 = vector.shape_cast %7 : vector<1x4x256xf32> to vector<4x256xf32>
    %cst = arith.constant dense<0.000000e+00> : vector<32x256xf32>
    %9 = tpu.matmul %0, %8, %cst {dimension_numbers = #tpu.dot_dimension_numbers<[1], [0], [0], [1], [0, 0, 1, 1], [], []>} : vector<32x4xf32>, vector<4x256xf32>, vector<32x256xf32> -> vector<32x256xf32>
    %10 = vector.broadcast %1 : vector<32x1xf32> to vector<32x256xf32>
    %11 = arith.addf %9, %10 : vector<32x256xf32>
    %cst_9 = arith.constant 0.000000e+00 : f32
    %12 = vector.broadcast %cst_9 : f32 to vector<32x256xf32>
    %13 = arith.maximumf %11, %12 : vector<32x256xf32>
    %cst_10 = arith.constant dense<0.000000e+00> : vector<8x256xf32>
    %14 = tpu.matmul %2, %13, %cst_10 {dimension_numbers = #tpu.dot_dimension_numbers<[1], [0], [0], [1], [0, 0, 1, 1], [], []>} : vector<8x32xf32>, vector<32x256xf32>, vector<8x256xf32> -> vector<8x256xf32>
    %15 = vector.broadcast %3 : vector<8x1xf32> to vector<8x256xf32>
    %16 = arith.addf %14, %15 : vector<8x256xf32>
    %c0_11 = arith.constant 0 : index
    %c0_12 = arith.constant 0 : index
    %17 = arith.index_cast %5 : i32 to index
    %18 = vector.load %arg7[%c0_11, %c0_12, %17] : memref<1x8x256xf32, #tpu.memory_space<vmem>>, vector<1x8x256xf32>
    %19 = vector.shape_cast %18 : vector<1x8x256xf32> to vector<8x256xf32>
    %20 = vector.shape_cast %16 : vector<8x256xf32> to vector<1x8x256xf32>
    tpu.vector_store %arg7[%c0_11, %c0_12, %17], %20 {strides = array<i32>} : memref<1x8x256xf32, #tpu.memory_space<vmem>>, vector<1x8x256xf32>,
    %c1_i32 = arith.constant 1 : i32
    return
  }
  func.func @transform_0(%arg0: i32, %arg1: i32) -> (i32, i32, i32) {
    %c0_i32 = arith.constant 0 : i32
    %c0_i32_0 = arith.constant 0 : i32
    return %arg0, %c0_i32, %arg1 : i32, i32, i32
  }
  func.func @transform_1(%arg0: i32, %arg1: i32) -> (i32, i32) {
    %c0_i32 = arith.constant 0 : i32
    %c0_i32_0 = arith.constant 0 : i32
    %c0_i32_1 = arith.constant 0 : i32
    return %c0_i32, %c0_i32_0 : i32, i32
  }
  func.func @transform_2(%arg0: i32, %arg1: i32) -> (i32, i32) {
    %c0_i32 = arith.constant 0 : i32
    %c0_i32_0 = arith.constant 0 : i32
    %c0_i32_1 = arith.constant 0 : i32
    return %c0_i32, %c0_i32_0 : i32, i32
  }
  func.func @transform_3(%arg0: i32, %arg1: i32) -> (i32, i32) {
    %c0_i32 = arith.constant 0 : i32
    %c0_i32_0 = arith.constant 0 : i32
    %c0_i32_1 = arith.constant 0 : i32
    return %c0_i32, %c0_i32_0 : i32, i32
  }
  func.func @transform_4(%arg0: i32, %arg1: i32) -> (i32, i32) {
    %c0_i32 = arith.constant 0 : i32
    %c0_i32_0 = arith.constant 0 : i32
    %c0_i32_1 = arith.constant 0 : i32
    return %c0_i32, %c0_i32_0 : i32, i32
  }
  func.func @transform_5(%arg0: i32, %arg1: i32) -> (i32, i32, i32) {
    %c0_i32 = arith.constant 0 : i32
    %c0_i32_0 = arith.constant 0 : i32
    return %arg0, %c0_i32, %arg1 : i32, i32, i32
  }
}

</mosaic_0001>

<bundles_post_ra>
// kernel: tpu_custom_call.1
= control target key start
LH: loop header
LB: loop body
LE: loop exit
PB: predicated region body
PF: predicated region fallthrough
CT: control target
= control target key end

     0   :  { %10 = vsyncpa [#allocation3], 0  ;;  %s853_s0 = inlined_call_operand.vmem [shape: f32[2,4,256], index: 0, kind: input, shape index: {}]   ;;  %s854_s1 = inlined_call_operand.vmem [shape: f32[32,4], index: 1, kind: input, shape index: {}]   ;;  %s855_s2 = inlined_call_operand.vmem [shape: f32[32,1], index: 2, kind: input, shape index: {}]   ;;  %s856_s3 = inlined_call_operand.vmem [shape: f32[8,32], index: 3, kind: input, shape index: {}]   ;;  %s857_s4 = inlined_call_operand.vmem [shape: f32[8,1], index: 4, kind: input, shape index: {}]   ;;  %s858_s5 = inlined_call_operand.hbm [shape: f32[2,8,256], index: 5, kind: output, shape index: {}]  }
   0x1   :  { %12 = vsyncpa [#allocation3 + $0x1], 0  ;;  %s718_s18 = smov 0   ;;  %s720_s19 = smov 0  }
   0x2   :  { %s722_s20 = smov 0   ;;  %s724_s21 = smov 0  }
   0x3   :  { %s726_s22 = smov 0   ;;  %s728_s23 = smov 0  }
   0x4 LB: > { %s519_s24 = sadd.s32 4294967295, %s685_s23   ;;  %s520_s25 = sadd.s32 4294967294, %s685_s23   ;;  %s685_s23 = sphi %s728_s23, %s18_s23   ;;  %s681_s22 = sphi %s726_s22, %s865_s22   ;;  %s677_s21 = sphi %s724_s21, %s864_s21   ;;  %s673_s20 = sphi %s722_s20, %s863_s20   ;;  %s669_s19 = sphi %s720_s19, %s862_s19   ;;  %s665_s18 = sphi %s718_s18, %s861_s18  }
   0x5   : > { %s30_s26 = sadd.s32 1, %s681_s22  ;;  %s151_s27 = sadd.s32 1, %s673_s20 }
   0x6   : > { %p32_p0 = scmp.ge.s32.totalorder %s30_s26, 2  ;;  %p161_p1 = scmp.ne.s32.totalorder %s673_s20, %s669_s19 }
   0x7   : > { %p162_p2 = scmp.eq.s32.totalorder %s519_s24, 1  ;;  %p167_p3 = scmp.ne.s32.totalorder %s669_s19, %s665_s18 }
   0x8   : > { %s867_s26 = smov (%p32_p0, %s30_s26), 0  ;;  %p168_p5 = scmp.eq.s32.totalorder %s520_s25, 1 }
   0x9   : > { %p758_p4 = por %p162_p2, %p161_p1  ;;  %s146_s29 = ssub.s32 %s681_s22, %s867_s26 }
   0xa   : > { %p523_p6 = scmp.ge.s32.totalorder %s685_s23, 1  ;;  %p149_p7 = scmp.eq.s32.totalorder %s146_s29, 0 }
   0xb   : > { %p765_p8 = por %p168_p5, %p167_p3  ;;  %p211_p9 = scmp.lt.s32.totalorder %s685_s23, 3 }
   0xc   : > { %s771_s6 = scalar_select %p149_p7, %s673_s20, %s151_s27  }
   0xd   : > { %p212_p10 = pnand %p523_p6, %p211_p9 }
   0xe   : > { %p244_p11 = scmp.lt.s32.totalorder (!%p212_p10), %s677_s21, 1  ;;  %s240_s17 = sand.u32 (!%p212_p10), 1, %s669_s19  }
   0xf   : > { %215 = sbr.rel (%p212_p10) target bundleno = 323 (0x143), region = 40  ;;  %s524_s24 = sshll.u32 (!%p212_p10), %s240_s17, 4 }
  0x10   : > { %s545_s25 = sshll.u32 (!%p212_p10), %s677_s21, 4  ;;  %s242_s8 = scalar_lea.vmem (!%p212_p10), [#allocation2], %s524_s24 }
  0x11   : > { %s438_s7 = scalar_lea.hbm (!%p212_p10), %s858_s5, %s545_s25  ;;  %s440_s9 = sshll.u32 (!%p212_p10), %s242_s8, 4  ;;  %s441_s9 = int_to_ptr.vmem [resolvable:$true] %s440_s9 }
  0x12   : > { %s442_s10 = sshll.u32 (!%p212_p10), %s438_s7, 4  ;;  %s443_s10 = int_to_ptr.hbm [resolvable:$true] %s442_s10 }
  0x14   : > { %v687_v0 = vmov 0   ;;  %v259_v1 = vld [vmem:[%s855_s2 + $0x8] sm:$0xff]  ;;  %v261_v2 = vld [vmem:[%s855_s2 + $0x18] sm:$0xff]  ;;  %s245_s11 = scalar_select %p244_p11, %s677_s21, 1  ;;  %v258_v4 = vld [vmem:[%s855_s2] sm:$0xff]  ;;  %vm302_vm0 = vcmask 1043456  }
  0x15   : > { %605 = vset.pattern.permute.xlu1 %v687_v0  ;;  %604 = vset.pattern.permute.xlu0 %v687_v0  ;;  %v260_v5 = vld [vmem:[%s855_s2 + $0x10] sm:$0xff]  ;;  %v254_v6 = vld [vmem:[%s854_s1] sm:$0xff]  ;;  %vm289_vm1 = vcmask 31744   ;;  %v257_v9 = vld [vmem:[%s854_s1 + $0x18] sm:$0xff]  ;;  %vm378_vm2 = vcmask 261120  }
  0x16   : > { %272 = vperm.xlu1 %605, %v259_v1   ;;  %282 = vperm.xlu0 %604, %v261_v2   ;;  %s544_s12 = sshll.u32 %s245_s11, 3  ;;  %v255_v10 = vld [vmem:[%s854_s1 + $0x8] sm:$0xff]  ;;  %v256_v11 = vld [vmem:[%s854_s1 + $0x10] sm:$0xff]  ;;  %v263_v12 = vld [vmem:[%s857_s4] sm:$0xff]  ;;  %s425_s11 = scalar_lea.sflag [#allocation3], %s240_s17 }
  0x17   : > { %606 = vset.pattern.permute.xlu2 %v687_v0  ;;  %s251_s15 = scalar_lea.vmem %s853_s0, %s544_s12  ;;  %v262_v40 = vld [vmem:[%s856_s3] sm:$0xff]  ;;  %s621_s12 = sshra.s32 %s443_s10, 4  ;;  %s622_s12 = int_to_ptr.hbm [resolvable:$true] %s621_s12 }
  0x18   : > { %v264_v3 = vld [vmem:[%s251_s15] sm:$0xff]  ;;  %375 = vperm.xlu2 %606, %v263_v12   ;;  %s623_s21 = scalar_lea.hbm %s622_s12, 16  ;;  %s627_s15 = scalar_lea.hbm %s858_s5, 32 }
  0x19   : > { %286 = vst [vmem:[#allocation1] ss:$2 sm:$0xff] %v264_v3  ;;  %p624_p12 = scmp.ne.s32.totalorder %s622_s12, %s623_s21  ;;  %p628_p1 = scmp.lt.s32.totalorder %s622_s12, %s858_s5 }
  0x1a   : > { %p629_p2 = scmp.lt.s32.totalorder %s627_s15, %s623_s21 }
  0x1b   : > { %p625_p13 = pnand %p624_p12, %p758_p4 }
  0x1c   : > { %p630_p3 = por %p629_p2, %p628_p1 }
  0x1d   : > { %p626_p0 = pneg %p625_p13 }
  0x1e   : > { %267 = vperm.xlu1 %605, %v258_v4   ;;  %277 = vperm.xlu0 %604, %v260_v5  }
  0x1f   : > { %p631_p5 = pnand %p630_p3, %p626_p0 }
  0x20   : > { %v287_v7 = vld.sshfl [vmem:[#allocation1] sm:$0xff pattern:$0x75316420]  ;;  %v288_v8 = vld.sshfl [vmem:[#allocation1 + $0x8] sm:$0xff pattern:$0x75316420] }
  0x21   : > { %527 = vmatpush.msk.msra.mxu0 %vm302_vm0, %v287_v7  ;;  %532 = vmatpush.msk.msra.mxu1 %vm302_vm0, %v288_v8 }
  0x22   : > { %528 = vmatmul.msk.f32.vlgmr.msra.gmra.mxu0 %vm289_vm1, %v254_v6  ;;  %533 = vmatmul.msk.f32.vlgmr.msra.gmra.mxu1 %vm289_vm1, %v254_v6 }
  0x23   : > { %546 = vmatpush.msk.msra.mxu2 %vm302_vm0, %v287_v7  ;;  %547 = vmatpush.msk.msra.mxu3 %vm302_vm0, %v288_v8 }
  0x24   : > { %531 = vmatmul.msk.f32.vlgmr.msra.gmra.mxu2 %vm289_vm1, %v257_v9  ;;  %536 = vmatmul.msk.f32.vlgmr.msra.gmra.mxu3 %vm289_vm1, %v257_v9 }
  0x2a   : > { %529 = vmatmul.msk.f32.gmra.mxu0 %vm289_vm1, %v255_v10  ;;  %534 = vmatmul.msk.f32.gmra.mxu1 %vm289_vm1, %v255_v10 }
  0x32   : > { %530 = vmatmul.msk.f32.gmra.mxu0 %vm289_vm1, %v256_v11  ;;  %535 = vmatmul.msk.f32.gmra.mxu1 %vm289_vm1, %v256_v11 }
  0x72   : > { %v376_v42 = vpop.permute.xlu2 %375 }
  0x88   : > { %v273_v15 = vpop.permute.xlu1 %272  ;;  %v283_v16 = vpop.permute.xlu0 %282 }
  0x90   : > { %v268_v25 = vpop.permute.xlu1 %267  ;;  %v278_v26 = vpop.permute.xlu0 %277 }
  0x9f   : > { %v324_v13 = vpop.f32.mrf.mxu0  ;;  %v353_v14 = vpop.f32.mrf.mxu1 }
  0xa0   : > { %v325_v33 = vadd.f32 %v324_v13, %v268_v25  ;;  %v354_v35 = vadd.f32 %v353_v14, %v268_v25 }
  0xa2   : > { %v365_v39 = vmax.f32 %v325_v33, 0.0  ;;  %v366_v41 = vmax.f32 %v354_v35, 0.0 }
  0xa7   : > { %v327_v17 = vpop.f32.mrf.mxu0  ;;  %v333_v18 = vpop.f32.mrf.mxu2 }
  0xa8   : > { %v334_v19 = vadd.f32 %v333_v18, %v283_v16  ;;  %v356_v20 = vpop.f32.mrf.mxu1  ;;  %v362_v21 = vpop.f32.mrf.mxu3  ;;  %v328_v28 = vadd.f32 %v327_v17, %v273_v15 }
  0xa9   : > { %v363_v22 = vadd.f32 %v362_v21, %v283_v16  ;;  %v357_v31 = vadd.f32 %v356_v20, %v273_v15 }
  0xaa   : > { %v371_v23 = vmax.f32 %v334_v19, 0.0  ;;  %v367_v37 = vmax.f32 %v328_v28, 0.0 }
  0xab   : > { %v372_v24 = vmax.f32 %v363_v22, 0.0  ;;  %v368_v38 = vmax.f32 %v357_v31, 0.0 }
  0xac   : > { %394 = vmatpush.msrb.mxu2 %v371_v23 }
  0xad   : > { %414 = vmatpush.msrb.mxu3 %v372_v24 }
  0xaf   : > { %v330_v27 = vpop.f32.mrf.mxu0 }
  0xb0   : > { %v331_v29 = vadd.f32 %v330_v27, %v278_v26  ;;  %v359_v30 = vpop.f32.mrf.mxu1 }
  0xb1   : > { %v360_v32 = vadd.f32 %v359_v30, %v278_v26 }
  0xb2   : > { %v369_v34 = vmax.f32 %v331_v29, 0.0 }
  0xb3   : > { %v370_v36 = vmax.f32 %v360_v32, 0.0 }
  0xb4   : > { %395 = vmatpush.msrb.mxu2 %v369_v34 }
  0xb5   : > { %415 = vmatpush.msrb.mxu3 %v370_v36 }
  0xb6   : > { %396 = vmatpush.msrb.mxu2 %v367_v37 }
  0xb7   : > { %416 = vmatpush.msrb.mxu3 %v368_v38 }
  0xb8   : > { %397 = vmatpush.msrb.mxu2 %v365_v39 }
  0xb9   : > { %417 = vmatpush.msrb.mxu3 %v366_v41  ;;  %537 = vmatmul.msk.f32.vlgmr.msrb.gmra.mxu2 %vm378_vm2, %v262_v40 }
  0xba   : > { %538 = vmatmul.msk.f32.vlgmr.msrb.gmra.mxu3 %vm378_vm2, %v262_v40 }
 0x13c   : > { %v399_v43 = vpop.f32.mrf.mxu2 }
 0x13d   : > { %v400_v44 = vadd.f32 %v399_v43, %v376_v42  ;;  %v419_v45 = vpop.f32.mrf.mxu3 }
 0x13e   : > { %v420_v46 = vadd.f32 %v419_v45, %v376_v42 }
 0x13f   : > { %422 = vst [vmem:[%s242_s8] sm:$0xff] %v400_v44 }
 0x140   : > { %423 = vst [vmem:[%s242_s8 + $0x8] sm:$0xff] %v420_v46 }
 0x141   : > { %634 = shalt.err (!%p631_p5)
}
 0x142   : > { %548 = dma.vmem_to_hbm [thread:$0]  (%p758_p4), %s441_s9, 256, %s443_s10, %s425_s11  }
 0x143 PF: > { %p554_p6 = scmp.ge.s32.totalorder %s685_s23, 2  ;;  %s454_s17 = sand.u32 1, %s665_s18  }
 0x144   : > { %s455_s25 = scalar_lea.sflag [#allocation3], %s454_s17 }
 0x145   : > { %p551_p7 = pnand %p554_p6, %p765_p8 }
 0x147   : > { %p552_p9 = pneg %p551_p7 }
 0x149   : > { %660 = dma.done.wait (%p552_p9), %s455_s25, 256  }
 0x14a   : > { %662 = vsyncadd (%p552_p9), %s455_s25, 4294967040  ;;  %s18_s23 = sadd.s32 1, %s685_s23   ;;  %s861_s18 = smov %s669_s19 }
 0x14b   : > { %p15_p10 = scmp.ge.s32.totalorder %s18_s23, 4   ;;  %s862_s19 = smov %s673_s20 }
 0x14c   : > { %s863_s20 = smov %s771_s6  ;;  %s864_s21 = smov %s681_s22 }
 0x14d   : > { %s865_s22 = smov %s867_s26  ;;  %17 = sbr.rel (!%p15_p10) target bundleno = 4 (0x4), region = 75 }
 0x152   :  { %461 = vsyncpa [#allocation3], 1 }
 0x153   :  { %463 = vsyncpa [#allocation3 + $0x1], 1 }

</bundles_post_ra>
